<compile_context>
chip_gen: v7x
topology: tpu7x:2x2x1
jax: 0.10.0
libtpu: 0.0.40
codegen_flags: <defaults>
</compile_context>

<pallas_src>
import functools

import jax
import jax.numpy as jnp
from jax.experimental import pallas as pl
from jax.experimental.pallas import tpu as pltpu

LANE = 128
SUBLANE_BF16 = 16


def _round_up(a: int, m: int) -> int:
    return (a + m - 1) // m * m


def _classifier_kernel(x_ref, w1_ref, b1_ref, w2_ref, b2_ref, o_ref, *, h_chunk):
    """Fused linear1 -> ReLU -> linear2 over H chunks (no VMEM h scratch)."""
    x = x_ref[...]                                   # (tm, F) bf16
    H = w1_ref.shape[1]
    acc = jnp.zeros(o_ref.shape, jnp.float32)        # (tm, Cp) f32 accumulator

    # Dropout(0.5) is the identity in eval mode.
    # TODO(synk): training-mode dropout would need pltpu.prng_seed /
    #             prng_random_bits with a host seed; PyTorch RNG cannot be
    #             matched bitwise.
    for c in range(H // h_chunk):
        lo = c * h_chunk
        # linear1 chunk: bf16 x bf16 -> f32 accumulation on the MXU.
        h = jnp.dot(x, w1_ref[:, lo:lo + h_chunk],
                    preferred_element_type=jnp.float32)
        h = jnp.maximum(h + b1_ref[:, lo:lo + h_chunk], 0.0)
        # linear2 chunk: accumulate into the f32 output accumulator; the bf16
        # intermediate never round-trips through VMEM.
        acc = acc + jnp.dot(h.astype(jnp.bfloat16),
                            w2_ref[lo:lo + h_chunk, :],
                            preferred_element_type=jnp.float32)

    o_ref[...] = acc + b2_ref[...]


def _pallas_classifier(xb, w1b, b1f, w2b, b2f, *, tm, h_chunk, vmem_limit):
    Bp, F = xb.shape
    H = w1b.shape[1]
    Cp = w2b.shape[1]
    grid = (pl.cdiv(Bp, tm),)
    kernel = functools.partial(_classifier_kernel, h_chunk=h_chunk)
    return pl.pallas_call(
        kernel,
        out_shape=jax.ShapeDtypeStruct((Bp, Cp), jnp.float32),
        grid_spec=pltpu.PrefetchScalarGridSpec(
            num_scalar_prefetch=0,
            grid=grid,
            in_specs=[
                pl.BlockSpec((tm, F), lambda i: (i, 0)),    # x tile
                pl.BlockSpec((F, H), lambda i: (0, 0)),     # W1 (resident)
                pl.BlockSpec((1, H), lambda i: (0, 0)),     # b1
                pl.BlockSpec((H, Cp), lambda i: (0, 0)),    # W2 (resident)
                pl.BlockSpec((1, Cp), lambda i: (0, 0)),    # b2
            ],
            out_specs=pl.BlockSpec((tm, Cp), lambda i: (i, 0)),
        ),
        compiler_params=pltpu.CompilerParams(
            # Batch axis is independent -> megacore sharding on v7x's 2 TCs
            # when the grid has >= 2 steps; no cost on v5e/v6e.
            dimension_semantics=("parallel",),
            vmem_limit_bytes=vmem_limit,
        ),
    )(xb, w1b, b1f, w2b, b2f)


def make_classifier(w1, b1, w2, b2, *, tm_max=256, h_chunk=256):
    """Build a jitted forward for the Classifier.

    w1: [F, H], b1: [H], w2: [H, C], b2: [C]  (weights already in x @ W layout,
    i.e. the transpose of PyTorch's nn.Linear [out, in] storage).
    The bf16 cast / lane padding of the parameters happens once, here.
    """
    F, H = w1.shape
    C = w2.shape[1]
    Cp = _round_up(C, LANE)
    if H % h_chunk != 0:
        h_chunk = H  # fall back to a single chunk

    # One-time parameter prep (hoisted out of the per-call path).
    w1b = jnp.asarray(w1, jnp.bfloat16)
    w2b = jnp.zeros((H, Cp), jnp.bfloat16).at[:, :C].set(
        jnp.asarray(w2, jnp.bfloat16))
    b1f = jnp.asarray(b1, jnp.float32).reshape(1, H)
    b2f = jnp.zeros((1, Cp), jnp.float32).at[:, :C].set(
        jnp.asarray(b2, jnp.float32))

    @jax.jit
    def forward(x):
        B = x.shape[0]
        # Pad batch only to the bf16 sublane (16); small batches are one exact
        # tile, large batches tile the grid over the batch.
        Bp = _round_up(max(B, 1), SUBLANE_BF16)
        tm = Bp if Bp <= tm_max else tm_max

        # VMEM budget: double-buffered resident weights/biases + x/out tiles.
        # TODO(synk): for very large F*H (>~16 MiB of bf16 weights) tile the
        #             contraction over a grid axis instead of keeping W1 resident.
        need = (2 * F * H * 2 + 2 * H * Cp * 2      # W1, W2 (bf16, 2 buffers)
                + 2 * tm * F * 2                    # x tiles (bf16)
                + 2 * tm * Cp * 4                   # out tiles (f32)
                + 2 * (H + Cp) * 4)                 # biases (f32)
        vmem_limit = int(min(max(need + (4 << 20), 16 << 20), 32 << 20))

        xb = jnp.zeros((Bp, F), jnp.bfloat16).at[:B].set(x.astype(jnp.bfloat16))
        out = _pallas_classifier(xb, w1b, b1f, w2b, b2f,
                                 tm=tm, h_chunk=h_chunk, vmem_limit=vmem_limit)
        return out[:B, :C]

    return forward


if __name__ == "__main__":
    # Small shapes consistent with the module: feature_size -> F, hidden 1024
    # (hard-coded in the module) -> H, n_classes -> C.  B=20 exercises the
    # batch-padding path (not a multiple of 16).
    B, F, H, C = 20, 256, 1024, 5

    key = jax.random.PRNGKey(0)
    kx, k1, k2, k3, k4 = jax.random.split(key, 5)

    x = jax.random.normal(kx, (B, F), dtype=jnp.float32)
    w1 = jax.random.normal(k1, (F, H), dtype=jnp.float32) * (1.0 / jnp.sqrt(F))
    b1 = jax.random.normal(k2, (H,), dtype=jnp.float32) * 0.01
    w2 = jax.random.normal(k3, (H, C), dtype=jnp.float32) * (1.0 / jnp.sqrt(H))
    b2 = jax.random.normal(k4, (C,), dtype=jnp.float32) * 0.01

    forward = make_classifier(w1, b1, w2, b2)
    out = jax.block_until_ready(forward(x))
    assert out.shape == (B, C)

    # Reference matching the kernel's bf16-input / f32-accumulate numerics.
    xr, w1r, w2r = (t.astype(jnp.bfloat16) for t in (x, w1, w2))
    hr = jnp.maximum(
        jnp.dot(xr, w1r, preferred_element_type=jnp.float32) + b1[None, :], 0.0)
    ref = jnp.dot(hr.astype(jnp.bfloat16), w2r,
                  preferred_element_type=jnp.float32) + b2[None, :]
    assert jnp.allclose(out, ref, atol=2e-2, rtol=2e-2), float(
        jnp.max(jnp.abs(out - ref)))

    # Loose sanity check against the pure-f32 reference (bf16 weights => ~1e-2 err).
    ref32 = jnp.maximum(x @ w1 + b1[None, :], 0.0) @ w2 + b2[None, :]
    assert jnp.allclose(out, ref32, atol=1e-1, rtol=1e-1)

    print("KERNEL_OK")
</pallas_src>

<mosaic_0001>
module attributes {stable_mosaic.version = 11 : i64} {
  func.func @_classifier_kernel(%arg0: i32, %arg1: memref<32x256xbf16, #tpu.memory_space<vmem>>, %arg2: memref<256x1024xbf16, #tpu.memory_space<vmem>>, %arg3: memref<1x1024xf32, #tpu.memory_space<vmem>>, %arg4: memref<1024x128xbf16, #tpu.memory_space<vmem>>, %arg5: memref<1x128xf32, #tpu.memory_space<vmem>>, %arg6: memref<32x128xf32, #tpu.memory_space<vmem>>) attributes {dimension_semantics = [#tpu.dimension_semantics<parallel>], iteration_bounds = array<i64: 1>, scalar_prefetch = 0 : i64, scratch_operands = 0 : i64, tpu.core_type = #tpu.core_type<tc>, window_params = [{transform_indices = @transform_0, window_bounds = array<i64: 32, 256>}, {pipeline_mode = #tpu.pipeline_mode<synchronous>, transform_indices = @transform_1, window_bounds = array<i64: 256, 1024>}, {pipeline_mode = #tpu.pipeline_mode<synchronous>, transform_indices = @transform_2, window_bounds = array<i64: 1, 1024>}, {pipeline_mode = #tpu.pipeline_mode<synchronous>, transform_indices = @transform_3, window_bounds = array<i64: 1024, 128>}, {pipeline_mode = #tpu.pipeline_mode<synchronous>, transform_indices = @transform_4, window_bounds = array<i64: 1, 128>}, {transform_indices = @transform_5, window_bounds = array<i64: 32, 128>}]} {
    %c0 = arith.constant 0 : index
    %c0_0 = arith.constant 0 : index
    %0 = vector.load %arg1[%c0, %c0_0] : memref<32x256xbf16, #tpu.memory_space<vmem>>, vector<32x256xbf16>
    %cst = arith.constant 0.000000e+00 : f32
    %1 = vector.broadcast %cst : f32 to vector<32x128xf32>
    %c0_1 = arith.constant 0 : index
    %c0_2 = arith.constant 0 : index
    %2 = vector.load %arg2[%c0_1, %c0_2] : memref<256x1024xbf16, #tpu.memory_space<vmem>>, vector<256x256xbf16>
    %cst_3 = arith.constant dense<0.000000e+00> : vector<32x256xf32>
    %3 = tpu.matmul %0, %2, %cst_3 {dimension_numbers = #tpu.dot_dimension_numbers<[1], [0], [0], [1], [0, 0, 1, 1], [], []>} : vector<32x256xbf16>, vector<256x256xbf16>, vector<32x256xf32> -> vector<32x256xf32>
    %c0_4 = arith.constant 0 : index
    %c0_5 = arith.constant 0 : index
    %4 = vector.load %arg3[%c0_4, %c0_5] : memref<1x1024xf32, #tpu.memory_space<vmem>>, vector<1x256xf32>
    %5 = vector.broadcast %4 : vector<1x256xf32> to vector<32x256xf32>
    %6 = arith.addf %3, %5 : vector<32x256xf32>
    %cst_6 = arith.constant 0.000000e+00 : f32
    %7 = vector.broadcast %cst_6 : f32 to vector<32x256xf32>
    %8 = arith.maximumf %6, %7 : vector<32x256xf32>
    %9 = arith.truncf %8 : vector<32x256xf32> to vector<32x256xbf16>
    %c0_7 = arith.constant 0 : index
    %c0_8 = arith.constant 0 : index
    %10 = vector.load %arg4[%c0_7, %c0_8] : memref<1024x128xbf16, #tpu.memory_space<vmem>>, vector<256x128xbf16>
    %cst_9 = arith.constant dense<0.000000e+00> : vector<32x128xf32>
    %11 = tpu.matmul %9, %10, %cst_9 {dimension_numbers = #tpu.dot_dimension_numbers<[1], [0], [0], [1], [0, 0, 1, 1], [], []>} : vector<32x256xbf16>, vector<256x128xbf16>, vector<32x128xf32> -> vector<32x128xf32>
    %12 = arith.addf %1, %11 : vector<32x128xf32>
    %c0_10 = arith.constant 0 : index
    %c256 = arith.constant 256 : index
    %13 = vector.load %arg2[%c0_10, %c256] : memref<256x1024xbf16, #tpu.memory_space<vmem>>, vector<256x256xbf16>
    %cst_11 = arith.constant dense<0.000000e+00> : vector<32x256xf32>
    %14 = tpu.matmul %0, %13, %cst_11 {dimension_numbers = #tpu.dot_dimension_numbers<[1], [0], [0], [1], [0, 0, 1, 1], [], []>} : vector<32x256xbf16>, vector<256x256xbf16>, vector<32x256xf32> -> vector<32x256xf32>
    %c0_12 = arith.constant 0 : index
    %c256_13 = arith.constant 256 : index
    %15 = vector.load %arg3[%c0_12, %c256_13] : memref<1x1024xf32, #tpu.memory_space<vmem>>, vector<1x256xf32>
    %16 = vector.broadcast %15 : vector<1x256xf32> to vector<32x256xf32>
    %17 = arith.addf %14, %16 : vector<32x256xf32>
    %cst_14 = arith.constant 0.000000e+00 : f32
    %18 = vector.broadcast %cst_14 : f32 to vector<32x256xf32>
    %19 = arith.maximumf %17, %18 : vector<32x256xf32>
    %20 = arith.truncf %19 : vector<32x256xf32> to vector<32x256xbf16>
    %c256_15 = arith.constant 256 : index
    %c0_16 = arith.constant 0 : index
    %21 = vector.load %arg4[%c256_15, %c0_16] : memref<1024x128xbf16, #tpu.memory_space<vmem>>, vector<256x128xbf16>
    %cst_17 = arith.constant dense<0.000000e+00> : vector<32x128xf32>
    %22 = tpu.matmul %20, %21, %cst_17 {dimension_numbers = #tpu.dot_dimension_numbers<[1], [0], [0], [1], [0, 0, 1, 1], [], []>} : vector<32x256xbf16>, vector<256x128xbf16>, vector<32x128xf32> -> vector<32x128xf32>
    %23 = arith.addf %12, %22 : vector<32x128xf32>
    %c0_18 = arith.constant 0 : index
    %c512 = arith.constant 512 : index
    %24 = vector.load %arg2[%c0_18, %c512] : memref<256x1024xbf16, #tpu.memory_space<vmem>>, vector<256x256xbf16>
    %cst_19 = arith.constant dense<0.000000e+00> : vector<32x256xf32>
    %25 = tpu.matmul %0, %24, %cst_19 {dimension_numbers = #tpu.dot_dimension_numbers<[1], [0], [0], [1], [0, 0, 1, 1], [], []>} : vector<32x256xbf16>, vector<256x256xbf16>, vector<32x256xf32> -> vector<32x256xf32>
    %c0_20 = arith.constant 0 : index
    %c512_21 = arith.constant 512 : index
    %26 = vector.load %arg3[%c0_20, %c512_21] : memref<1x1024xf32, #tpu.memory_space<vmem>>, vector<1x256xf32>
    %27 = vector.broadcast %26 : vector<1x256xf32> to vector<32x256xf32>
    %28 = arith.addf %25, %27 : vector<32x256xf32>
    %cst_22 = arith.constant 0.000000e+00 : f32
    %29 = vector.broadcast %cst_22 : f32 to vector<32x256xf32>
    %30 = arith.maximumf %28, %29 : vector<32x256xf32>
    %31 = arith.truncf %30 : vector<32x256xf32> to vector<32x256xbf16>
    %c512_23 = arith.constant 512 : index
    %c0_24 = arith.constant 0 : index
    %32 = vector.load %arg4[%c512_23, %c0_24] : memref<1024x128xbf16, #tpu.memory_space<vmem>>, vector<256x128xbf16>
    %cst_25 = arith.constant dense<0.000000e+00> : vector<32x128xf32>
    %33 = tpu.matmul %31, %32, %cst_25 {dimension_numbers = #tpu.dot_dimension_numbers<[1], [0], [0], [1], [0, 0, 1, 1], [], []>} : vector<32x256xbf16>, vector<256x128xbf16>, vector<32x128xf32> -> vector<32x128xf32>
    %34 = arith.addf %23, %33 : vector<32x128xf32>
    %c0_26 = arith.constant 0 : index
    %c768 = arith.constant 768 : index
    %35 = vector.load %arg2[%c0_26, %c768] : memref<256x1024xbf16, #tpu.memory_space<vmem>>, vector<256x256xbf16>
    %cst_27 = arith.constant dense<0.000000e+00> : vector<32x256xf32>
    %36 = tpu.matmul %0, %35, %cst_27 {dimension_numbers = #tpu.dot_dimension_numbers<[1], [0], [0], [1], [0, 0, 1, 1], [], []>} : vector<32x256xbf16>, vector<256x256xbf16>, vector<32x256xf32> -> vector<32x256xf32>
    %c0_28 = arith.constant 0 : index
    %c768_29 = arith.constant 768 : index
    %37 = vector.load %arg3[%c0_28, %c768_29] : memref<1x1024xf32, #tpu.memory_space<vmem>>, vector<1x256xf32>
    %38 = vector.broadcast %37 : vector<1x256xf32> to vector<32x256xf32>
    %39 = arith.addf %36, %38 : vector<32x256xf32>
    %cst_30 = arith.constant 0.000000e+00 : f32
    %40 = vector.broadcast %cst_30 : f32 to vector<32x256xf32>
    %41 = arith.maximumf %39, %40 : vector<32x256xf32>
    %42 = arith.truncf %41 : vector<32x256xf32> to vector<32x256xbf16>
    %c768_31 = arith.constant 768 : index
    %c0_32 = arith.constant 0 : index
    %43 = vector.load %arg4[%c768_31, %c0_32] : memref<1024x128xbf16, #tpu.memory_space<vmem>>, vector<256x128xbf16>
    %cst_33 = arith.constant dense<0.000000e+00> : vector<32x128xf32>
    %44 = tpu.matmul %42, %43, %cst_33 {dimension_numbers = #tpu.dot_dimension_numbers<[1], [0], [0], [1], [0, 0, 1, 1], [], []>} : vector<32x256xbf16>, vector<256x128xbf16>, vector<32x128xf32> -> vector<32x128xf32>
    %45 = arith.addf %34, %44 : vector<32x128xf32>
    %c0_34 = arith.constant 0 : index
    %c0_35 = arith.constant 0 : index
    %46 = vector.load %arg5[%c0_34, %c0_35] : memref<1x128xf32, #tpu.memory_space<vmem>>, vector<1x128xf32>
    %47 = vector.broadcast %46 : vector<1x128xf32> to vector<32x128xf32>
    %48 = arith.addf %45, %47 : vector<32x128xf32>
    %c0_36 = arith.constant 0 : index
    %c0_37 = arith.constant 0 : index
    %49 = vector.load %arg6[%c0_36, %c0_37] : memref<32x128xf32, #tpu.memory_space<vmem>>, vector<32x128xf32>
    tpu.vector_store %arg6[%c0_36, %c0_37], %48 {strides = array<i32>} : memref<32x128xf32, #tpu.memory_space<vmem>>, vector<32x128xf32>,
    return
  }
  func.func @transform_0(%arg0: i32) -> (i32, i32) {
    %c0_i32 = arith.constant 0 : i32
    %c0_i32_0 = arith.constant 0 : i32
    return %arg0, %c0_i32 : i32, i32
  }
  func.func @transform_1(%arg0: i32) -> (i32, i32) {
    %c0_i32 = arith.constant 0 : i32
    %c0_i32_0 = arith.constant 0 : i32
    %c0_i32_1 = arith.constant 0 : i32
    return %c0_i32, %c0_i32_0 : i32, i32
  }
  func.func @transform_2(%arg0: i32) -> (i32, i32) {
    %c0_i32 = arith.constant 0 : i32
    %c0_i32_0 = arith.constant 0 : i32
    %c0_i32_1 = arith.constant 0 : i32
    return %c0_i32, %c0_i32_0 : i32, i32
  }
  func.func @transform_3(%arg0: i32) -> (i32, i32) {
    %c0_i32 = arith.constant 0 : i32
    %c0_i32_0 = arith.constant 0 : i32
    %c0_i32_1 = arith.constant 0 : i32
    return %c0_i32, %c0_i32_0 : i32, i32
  }
  func.func @transform_4(%arg0: i32) -> (i32, i32) {
    %c0_i32 = arith.constant 0 : i32
    %c0_i32_0 = arith.constant 0 : i32
    %c0_i32_1 = arith.constant 0 : i32
    return %c0_i32, %c0_i32_0 : i32, i32
  }
  func.func @transform_5(%arg0: i32) -> (i32, i32) {
    %c0_i32 = arith.constant 0 : i32
    %c0_i32_0 = arith.constant 0 : i32
    return %arg0, %c0_i32 : i32, i32
  }
}

</mosaic_0001>

<bundles_post_ra>
// kernel: forward.1
= control target key start
LH: loop header
LB: loop body
LE: loop exit
PB: predicated region body
PF: predicated region fallthrough
CT: control target
= control target key end

     0   :  { %s2953_s1 = inlined_call_operand.vmem [shape: bf16[256,1024], index: 1, kind: input, shape index: {}]   ;;  %s2954_s0 = inlined_call_operand.vmem [shape: bf16[32,256], index: 0, kind: input, shape index: {}]   ;;  %s2955_s3 = inlined_call_operand.vmem [shape: bf16[1024,128], index: 3, kind: input, shape index: {}]   ;;  %s2956_s2 = inlined_call_operand.vmem [shape: f32[1,1024], index: 2, kind: input, shape index: {}]   ;;  %s2957_s4 = inlined_call_operand.vmem [shape: f32[1,128], index: 4, kind: input, shape index: {}]   ;;  %s2958_s5 = inlined_call_operand.vmem [shape: f32[32,128], index: 5, kind: output, shape index: {}]  }
   0x1   :  { %v25_v0 = vld [vmem:[%s2953_s1] sm:$0xff]  ;;  %v346_v2 = vld [vmem:[%s2953_s1 + $0x8] sm:$0xff] }
   0x2   :  { %v26_v1 = vld [vmem:[%s2953_s1 + $0x20] sm:$0xff]  ;;  %v347_v4 = vld [vmem:[%s2953_s1 + $0x28] sm:$0xff] }
   0x3   :  { %v1861_v3 = vcombine.high %v25_v0, %v26_v1  ;;  %v1860_v5 = vcombine.low %v25_v0, %v26_v1  ;;  %v27_v6 = vld [vmem:[%s2953_s1 + $0x40] sm:$0xff]  ;;  %v1893_v8 = vcombine.high %v346_v2, %v347_v4  ;;  %v1892_v9 = vcombine.low %v346_v2, %v347_v4  ;;  %v348_v11 = vld [vmem:[%s2953_s1 + $0x48] sm:$0xff] }
   0x4   :  { %v28_v7 = vld [vmem:[%s2953_s1 + $0x60] sm:$0xff]  ;;  %v349_v12 = vld [vmem:[%s2953_s1 + $0x68] sm:$0xff] }
   0x5   :  { %v1863_v10 = vcombine.high %v27_v6, %v28_v7  ;;  %v29_v13 = vld [vmem:[%s2953_s1 + $0x80] sm:$0xff]  ;;  %249 = vmatprep.subr.bf16.mxu0 %v1861_v3  ;;  %v1895_v14 = vcombine.high %v348_v11, %v349_v12  ;;  %v350_v16 = vld [vmem:[%s2953_s1 + $0x88] sm:$0xff]  ;;  %550 = vmatprep.subr.bf16.mxu1 %v1893_v8  ;;  %v1862_v18 = vcombine.low %v27_v6, %v28_v7 }
   0x6   :  { %v30_v15 = vld [vmem:[%s2953_s1 + $0xa0] sm:$0xff]  ;;  %v351_v17 = vld [vmem:[%s2953_s1 + $0xa8] sm:$0xff]  ;;  %250 = vmatpush1.bf16.msra.mxu0 %v1860_v5  ;;  %551 = vmatpush1.bf16.msra.mxu1 %v1892_v9  ;;  %v1894_v19 = vcombine.low %v348_v11, %v349_v12 }
   0x7   :  { %251 = vmatprep.subr.bf16.mxu0 %v1863_v10  ;;  %v1865_v20 = vcombine.high %v29_v13, %v30_v15  ;;  %552 = vmatprep.subr.bf16.mxu1 %v1895_v14  ;;  %v1897_v21 = vcombine.high %v350_v16, %v351_v17  ;;  %v31_v22 = vld [vmem:[%s2953_s1 + $0xc0] sm:$0xff]  ;;  %v352_v24 = vld [vmem:[%s2953_s1 + $0xc8] sm:$0xff]  ;;  %v1864_v26 = vcombine.low %v29_v13, %v30_v15 }
   0x8   :  { %v32_v23 = vld [vmem:[%s2953_s1 + $0xe0] sm:$0xff]  ;;  %v353_v25 = vld [vmem:[%s2953_s1 + $0xe8] sm:$0xff]  ;;  %v1896_v27 = vcombine.low %v350_v16, %v351_v17 }
   0x9   :  { %v1867_v28 = vcombine.high %v31_v22, %v32_v23  ;;  %v1899_v29 = vcombine.high %v352_v24, %v353_v25  ;;  %v33_v30 = vld [vmem:[%s2953_s1 + $0x100] sm:$0xff]  ;;  %v354_v32 = vld [vmem:[%s2953_s1 + $0x108] sm:$0xff]  ;;  %v1866_v34 = vcombine.low %v31_v22, %v32_v23  ;;  %v1898_v35 = vcombine.low %v352_v24, %v353_v25 }
   0xa   :  { %252 = vmatpush1.bf16.msra.mxu0 %v1862_v18  ;;  %553 = vmatpush1.bf16.msra.mxu1 %v1894_v19  ;;  %v34_v31 = vld [vmem:[%s2953_s1 + $0x120] sm:$0xff]  ;;  %v355_v33 = vld [vmem:[%s2953_s1 + $0x128] sm:$0xff] }
   0xb   :  { %253 = vmatprep.subr.bf16.mxu0 %v1865_v20  ;;  %554 = vmatprep.subr.bf16.mxu1 %v1897_v21  ;;  %v1869_v36 = vcombine.high %v33_v30, %v34_v31  ;;  %v1901_v37 = vcombine.high %v354_v32, %v355_v33  ;;  %v35_v38 = vld [vmem:[%s2953_s1 + $0x140] sm:$0xff]  ;;  %v356_v40 = vld [vmem:[%s2953_s1 + $0x148] sm:$0xff]  ;;  %v1868_v42 = vcombine.low %v33_v30, %v34_v31 }
   0xc   :  { %v36_v39 = vld [vmem:[%s2953_s1 + $0x160] sm:$0xff]  ;;  %v357_v41 = vld [vmem:[%s2953_s1 + $0x168] sm:$0xff]  ;;  %v1900_v43 = vcombine.low %v354_v32, %v355_v33 }
   0xd   :  { %v1871_v44 = vcombine.high %v35_v38, %v36_v39  ;;  %v1903_v45 = vcombine.high %v356_v40, %v357_v41  ;;  %v37_v46 = vld [vmem:[%s2953_s1 + $0x180] sm:$0xff]  ;;  %v358_v48 = vld [vmem:[%s2953_s1 + $0x188] sm:$0xff]  ;;  %v1870_v50 = vcombine.low %v35_v38, %v36_v39  ;;  %v1902_v51 = vcombine.low %v356_v40, %v357_v41 }
   0xe   :  { %254 = vmatpush1.bf16.msra.mxu0 %v1864_v26  ;;  %555 = vmatpush1.bf16.msra.mxu1 %v1896_v27  ;;  %v38_v47 = vld [vmem:[%s2953_s1 + $0x1a0] sm:$0xff]  ;;  %v359_v49 = vld [vmem:[%s2953_s1 + $0x1a8] sm:$0xff] }
   0xf   :  { %255 = vmatprep.subr.bf16.mxu0 %v1867_v28  ;;  %556 = vmatprep.subr.bf16.mxu1 %v1899_v29  ;;  %v1873_v52 = vcombine.high %v37_v46, %v38_v47  ;;  %v39_v53 = vld [vmem:[%s2953_s1 + $0x1c0] sm:$0xff]  ;;  %v1905_v54 = vcombine.high %v358_v48, %v359_v49  ;;  %v360_v57 = vld [vmem:[%s2953_s1 + $0x1c8] sm:$0xff]  ;;  %v1872_v59 = vcombine.low %v37_v46, %v38_v47 }
  0x10   :  { %v40_v55 = vld [vmem:[%s2953_s1 + $0x1e0] sm:$0xff]  ;;  %v361_v58 = vld [vmem:[%s2953_s1 + $0x1e8] sm:$0xff]  ;;  %v1904_v61 = vcombine.low %v358_v48, %v359_v49 }
  0x11   :  { %v2359_v56 = vld [vmem:[%s2954_s0 + $0x4] ss:$8 sps:$4 sm:$0xff]   ;;  %v1875_v62 = vcombine.high %v39_v53, %v40_v55  ;;  %v1907_v0 = vcombine.high %v360_v57, %v361_v58  ;;  %v1874_v3 = vcombine.low %v39_v53, %v40_v55  ;;  %v1906_v5 = vcombine.low %v360_v57, %v361_v58 }
  0x12   :  { %256 = vmatpush1.bf16.msra.mxu0 %v1866_v34  ;;  %557 = vmatpush1.bf16.msra.mxu1 %v1898_v35  ;;  %v41_v60 = vld [vmem:[%s2953_s1 + $0x200] sm:$0xff]  ;;  %v362_v1 = vld [vmem:[%s2953_s1 + $0x208] sm:$0xff] }
  0x13   :  { %257 = vmatprep.subr.bf16.mxu0 %v1869_v36  ;;  %558 = vmatprep.subr.bf16.mxu1 %v1901_v37  ;;  %v42_v63 = vld [vmem:[%s2953_s1 + $0x220] sm:$0xff]  ;;  %v363_v2 = vld [vmem:[%s2953_s1 + $0x228] sm:$0xff] }
  0x14   :  { %281 = vmatprep.mubr.bf16.mxu0 %v2359_v56  ;;  %582 = vmatprep.mubr.bf16.mxu1 %v2359_v56  ;;  %v43_v4 = vld [vmem:[%s2953_s1 + $0x240] sm:$0xff]  ;;  %v1877_v6 = vcombine.high %v41_v60, %v42_v63  ;;  %v1909_v8 = vcombine.high %v362_v1, %v363_v2  ;;  %v364_v9 = vld [vmem:[%s2953_s1 + $0x248] sm:$0xff]  ;;  %v1876_v11 = vcombine.low %v41_v60, %v42_v63 }
  0x15   :  { %v44_v7 = vld [vmem:[%s2953_s1 + $0x260] sm:$0xff]  ;;  %v365_v10 = vld [vmem:[%s2953_s1 + $0x268] sm:$0xff]  ;;  %v1908_v13 = vcombine.low %v362_v1, %v363_v2 }
  0x16   :  { %258 = vmatpush1.bf16.msra.mxu0 %v1868_v42  ;;  %559 = vmatpush1.bf16.msra.mxu1 %v1900_v43  ;;  %v45_v12 = vld [vmem:[%s2953_s1 + $0x280] sm:$0xff]  ;;  %v1879_v14 = vcombine.high %v43_v4, %v44_v7  ;;  %v1911_v16 = vcombine.high %v364_v9, %v365_v10  ;;  %v366_v17 = vld [vmem:[%s2953_s1 + $0x288] sm:$0xff]  ;;  %v1878_v19 = vcombine.low %v43_v4, %v44_v7 }
  0x17   :  { %259 = vmatprep.subr.bf16.mxu0 %v1871_v44  ;;  %560 = vmatprep.subr.bf16.mxu1 %v1903_v45  ;;  %v46_v15 = vld [vmem:[%s2953_s1 + $0x2a0] sm:$0xff]  ;;  %v367_v18 = vld [vmem:[%s2953_s1 + $0x2a8] sm:$0xff]  ;;  %v1910_v21 = vcombine.low %v364_v9, %v365_v10 }
  0x18   :  { %v47_v20 = vld [vmem:[%s2953_s1 + $0x2c0] sm:$0xff]  ;;  %v1881_v22 = vcombine.high %v45_v12, %v46_v15  ;;  %v1913_v24 = vcombine.high %v366_v17, %v367_v18  ;;  %v368_v25 = vld [vmem:[%s2953_s1 + $0x2c8] sm:$0xff]  ;;  %v1880_v27 = vcombine.low %v45_v12, %v46_v15  ;;  %v1912_v29 = vcombine.low %v366_v17, %v367_v18  ;;  %v2179_v12 = vld [vmem:[%s2955_s3 + $0xd0] sm:$0xff]  }
  0x19   :  { %v48_v23 = vld [vmem:[%s2953_s1 + $0x2e0] sm:$0xff]  ;;  %v369_v26 = vld [vmem:[%s2953_s1 + $0x2e8] sm:$0xff]  ;;  %v2180_v15 = vld [vmem:[%s2955_s3 + $0x90] sm:$0xff]  }
  0x1a   :  { %260 = vmatpush1.bf16.msra.mxu0 %v1870_v50  ;;  %561 = vmatpush1.bf16.msra.mxu1 %v1902_v51  ;;  %v49_v28 = vld [vmem:[%s2953_s1 + $0x300] sm:$0xff]  ;;  %v1883_v30 = vcombine.high %v47_v20, %v48_v23  ;;  %v1915_v32 = vcombine.high %v368_v25, %v369_v26  ;;  %v370_v33 = vld [vmem:[%s2953_s1 + $0x308] sm:$0xff]  ;;  %v1882_v35 = vcombine.low %v47_v20, %v48_v23  ;;  %v2183_v17 = vld [vmem:[%s2955_s3 + $0xd8] sm:$0xff]  }
  0x1b   :  { %261 = vmatprep.subr.bf16.mxu0 %v1873_v52  ;;  %562 = vmatprep.subr.bf16.mxu1 %v1905_v54  ;;  %v50_v31 = vld [vmem:[%s2953_s1 + $0x320] sm:$0xff]  ;;  %v371_v34 = vld [vmem:[%s2953_s1 + $0x328] sm:$0xff]  ;;  %v1914_v37 = vcombine.low %v368_v25, %v369_v26  ;;  %v2185_v18 = vld [vmem:[%s2955_s3 + $0x58] sm:$0xff]  }
  0x1c   :  { %v51_v36 = vld [vmem:[%s2953_s1 + $0x340] sm:$0xff]  ;;  %v1885_v38 = vcombine.high %v49_v28, %v50_v31  ;;  %v1917_v40 = vcombine.high %v370_v33, %v371_v34  ;;  %v372_v41 = vld [vmem:[%s2953_s1 + $0x348] sm:$0xff]  ;;  %v1884_v43 = vcombine.low %v49_v28, %v50_v31  ;;  %v1916_v46 = vcombine.low %v370_v33, %v371_v34  ;;  %v2186_v20 = vld [vmem:[%s2955_s3 + $0x18] sm:$0xff]  }
  0x1d   :  { %v52_v39 = vld [vmem:[%s2953_s1 + $0x360] sm:$0xff]  ;;  %v373_v42 = vld [vmem:[%s2953_s1 + $0x368] sm:$0xff]  ;;  %v2197_v31 = vld [vmem:[%s2955_s3 + $0x70] sm:$0xff]  }
  0x1e   :  { %262 = vmatpush1.bf16.msra.mxu0 %v1872_v59  ;;  %563 = vmatpush1.bf16.msra.mxu1 %v1904_v61  ;;  %v53_v44 = vld [vmem:[%s2953_s1 + $0x380] sm:$0xff]  ;;  %v1887_v47 = vcombine.high %v51_v36, %v52_v39  ;;  %v374_v48 = vld [vmem:[%s2953_s1 + $0x388] sm:$0xff]  ;;  %v1919_v50 = vcombine.high %v372_v41, %v373_v42  ;;  %v1886_v51 = vcombine.low %v51_v36, %v52_v39  ;;  %v2199_v33 = vld [vmem:[%s2955_s3 + $0xf8] sm:$0xff]  }
  0x1f   :  { %263 = vmatprep.subr.bf16.mxu0 %v1875_v62  ;;  %564 = vmatprep.subr.bf16.mxu1 %v1907_v0  ;;  %v54_v45 = vld [vmem:[%s2953_s1 + $0x3a0] sm:$0xff]  ;;  %v375_v49 = vld [vmem:[%s2953_s1 + $0x3a8] sm:$0xff]  ;;  %v1918_v54 = vcombine.low %v372_v41, %v373_v42  ;;  %v2200_v34 = vld [vmem:[%s2955_s3 + $0xb8] sm:$0xff]   ;;  %v59_v41 = vlaneseq }
  0x20   :  { %v55_v52 = vld [vmem:[%s2953_s1 + $0x3c0] sm:$0xff]  ;;  %v1889_v55 = vcombine.high %v53_v44, %v54_v45  ;;  %v376_v57 = vld [vmem:[%s2953_s1 + $0x3c8] sm:$0xff]  ;;  %v1921_v59 = vcombine.high %v374_v48, %v375_v49  ;;  %v1888_v60 = vcombine.low %v53_v44, %v54_v45  ;;  %v1920_v61 = vcombine.low %v374_v48, %v375_v49  ;;  %v2202_v36 = vld [vmem:[%s2955_s3 + $0x38] sm:$0xff]  }
  0x21   :  { %v56_v53 = vld [vmem:[%s2953_s1 + $0x3e0] sm:$0xff]  ;;  %v377_v58 = vld [vmem:[%s2953_s1 + $0x3e8] sm:$0xff]  ;;  %v60_v42 = vshrl.u32 %v59_v41, 7 }
  0x22   :  { %264 = vmatpush1.bf16.msra.mxu0 %v1874_v3  ;;  %565 = vmatpush1.bf16.msra.mxu1 %v1906_v5  ;;  %v1891_v62 = vcombine.high %v55_v52, %v56_v53  ;;  %v1923_v63 = vcombine.high %v376_v57, %v377_v58  ;;  %v2171_v0 = vld [vmem:[%s2955_s3 + $0xc0] sm:$0xff]   ;;  %v1890_v1 = vcombine.low %v55_v52, %v56_v53  ;;  %v2479_v5 = vld [vmem:[%s2954_s0 + $0x14] ss:$8 sps:$4 sm:$0xff]   ;;  %v2177_v9 = vld [vmem:[%s2955_s3 + $0x48] sm:$0xff]  }
  0x23   :  { %265 = vmatprep.subr.bf16.mxu0 %v1877_v6  ;;  %566 = vmatprep.subr.bf16.mxu1 %v1909_v8  ;;  %v2173_v2 = vld [vmem:[%s2955_s3 + $0x40] sm:$0xff]   ;;  %v1922_v3 = vcombine.low %v376_v57, %v377_v58  ;;  %v2175_v8 = vld [vmem:[%s2955_s3 + $0xc8] sm:$0xff]   ;;  %v2599_v44 = vsub.s32 0, %v60_v42 }
  0x24   :  { %v2474_v4 = vld [vmem:[%s2954_s0] ss:$8 sps:$4 sm:$0xff]  }
  0x25   :  { %v2172_v6 = vld [vmem:[%s2955_s3 + $0x80] sm:$0xff]   ;;  %v2176_v10 = vld [vmem:[%s2955_s3 + $0x88] sm:$0xff]  }
  0x26   :  { %266 = vmatpush1.bf16.msra.mxu0 %v1876_v11  ;;  %567 = vmatpush1.bf16.msra.mxu1 %v1908_v13  ;;  %v2174_v7 = vld [vmem:[%s2955_s3] sm:$0xff]   ;;  %v2178_v11 = vld [vmem:[%s2955_s3 + $0x8] sm:$0xff]   ;;  %v2509_v13 = vld [vmem:[%s2954_s0 + $0x10] ss:$8 sps:$4 sm:$0xff]  }
  0x27   :  { %267 = vmatprep.subr.bf16.mxu0 %v1879_v14  ;;  %568 = vmatprep.subr.bf16.mxu1 %v1911_v16  ;;  %v2181_v14 = vld [vmem:[%s2955_s3 + $0x50] sm:$0xff]   ;;  %v2188_v23 = vld [vmem:[%s2955_s3 + $0xa0] sm:$0xff]   ;;  %v2191_v25 = vld [vmem:[%s2955_s3 + $0xe8] sm:$0xff]  }
  0x28   :  { %v2182_v16 = vld [vmem:[%s2955_s3 + $0x10] sm:$0xff]   ;;  %v2193_v26 = vld [vmem:[%s2955_s3 + $0x68] sm:$0xff]   ;;  %v378_v45 = vld [vmem:[%s2956_s2 + $0x2] sm:$0x3] }
  0x29   :  { %v2194_v28 = vld [vmem:[%s2955_s3 + $0x28] sm:$0xff]   ;;  %v383_v48 = vrot.slane %v378_v45, %v2599_v44 }
  0x2a   :  { %268 = vmatpush1.bf16.msra.mxu0 %v1878_v19  ;;  %569 = vmatpush1.bf16.msra.mxu1 %v1910_v21  ;;  %v2184_v19 = vld [vmem:[%s2955_s3 + $0x98] sm:$0xff]   ;;  %v2187_v21 = vld [vmem:[%s2955_s3 + $0xe0] sm:$0xff]  }
  0x2b   :  { %269 = vmatprep.subr.bf16.mxu0 %v1881_v22  ;;  %570 = vmatprep.subr.bf16.mxu1 %v1913_v24  ;;  %v2189_v22 = vld [vmem:[%s2955_s3 + $0x60] sm:$0xff]  }
  0x2c   :  { %v2190_v24 = vld [vmem:[%s2955_s3 + $0x20] sm:$0xff]  }
  0x2e   :  { %270 = vmatpush1.bf16.msra.mxu0 %v1880_v27  ;;  %571 = vmatpush1.bf16.msra.mxu1 %v1912_v29  ;;  %v2192_v27 = vld [vmem:[%s2955_s3 + $0xa8] sm:$0xff]   ;;  %v2195_v29 = vld [vmem:[%s2955_s3 + $0xf0] sm:$0xff]  }
  0x2f   :  { %271 = vmatprep.subr.bf16.mxu0 %v1883_v30  ;;  %572 = vmatprep.subr.bf16.mxu1 %v1915_v32  ;;  %v2196_v30 = vld [vmem:[%s2955_s3 + $0xb0] sm:$0xff]  }
  0x30   :  { %v2198_v32 = vld [vmem:[%s2955_s3 + $0x30] sm:$0xff]  }
  0x32   :  { %272 = vmatpush1.bf16.msra.mxu0 %v1882_v35  ;;  %573 = vmatpush1.bf16.msra.mxu1 %v1914_v37  ;;  %v2201_v35 = vld [vmem:[%s2955_s3 + $0x78] sm:$0xff]   ;;  %v2585_v37 = vld [vmem:[%s2953_s1 + $0x10] sm:$0xff] }
  0x33   :  { %273 = vmatprep.subr.bf16.mxu0 %v1885_v38  ;;  %574 = vmatprep.subr.bf16.mxu1 %v1917_v40  ;;  %v2590_v38 = vld [vmem:[%s2953_s1 + $0x30] sm:$0xff] }
  0x34   :  { %v1957_v39 = vcombine.high %v2585_v37, %v2590_v38  ;;  %v1956_v40 = vcombine.low %v2585_v37, %v2590_v38 }
  0x36   :  { %274 = vmatpush1.bf16.msra.mxu0 %v1884_v43  ;;  %575 = vmatpush1.bf16.msra.mxu1 %v1916_v46  ;;  %v57_v43 = vld [vmem:[%s2956_s2] sm:$0x3]  ;;  %v2604_v46 = vsub.s32 1, %v60_v42 }
  0x37   :  { %275 = vmatprep.subr.bf16.mxu0 %v1887_v47  ;;  %576 = vmatprep.subr.bf16.mxu1 %v1919_v50  ;;  %v62_v47 = vrot.slane %v57_v43, %v2599_v44 }
  0x38   :  { %v66_v49 = vrot.slane %v57_v43, %v2604_v46  ;;  %v387_v50 = vrot.slane %v378_v45, %v2604_v46 }
  0x3a   :  { %276 = vmatpush1.bf16.msra.mxu0 %v1886_v51  ;;  %577 = vmatpush1.bf16.msra.mxu1 %v1918_v54 }
  0x3b   :  { %277 = vmatprep.subr.bf16.mxu0 %v1889_v55  ;;  %578 = vmatprep.subr.bf16.mxu1 %v1921_v59 }
  0x3e   :  { %278 = vmatpush1.bf16.msra.mxu0 %v1888_v60  ;;  %579 = vmatpush1.bf16.msra.mxu1 %v1920_v61 }
  0x3f   :  { %279 = vmatprep.subr.bf16.mxu0 %v1891_v62  ;;  %580 = vmatprep.subr.bf16.mxu1 %v1923_v63 }
  0x42   :  { %280 = vmatpush1.bf16.msra.mxu0 %v1890_v1  ;;  %581 = vmatpush1.bf16.msra.mxu1 %v1922_v3 }
  0x43   :  { %2053 = vmatprep.subr.bf16.mxu0 %v2171_v0  ;;  %2081 = vmatprep.subr.bf16.mxu1 %v2173_v2 }
  0x45   :  { %282 = vmatmul.mubr.bf16.vlgmr.msra.gmra.mrb[0].mxu0 %v2474_v4  ;;  %583 = vmatmul.mubr.bf16.vlgmr.msra.gmra.mrb[0].mxu1 %v2474_v4 }
  0x46   :  { %291 = vmatprep.mubr.bf16.mxu0 %v2479_v5  ;;  %592 = vmatprep.mubr.bf16.mxu1 %v2479_v5 }
  0x47   :  { %2054 = vmatpush3.bf16.msra.mxu0 %v2172_v6  ;;  %2082 = vmatpush3.bf16.msra.mxu1 %v2174_v7 }
  0x48   :  { %2055 = vmatprep.subr.bf16.mxu0 %v2175_v8  ;;  %2083 = vmatprep.subr.bf16.mxu1 %v2177_v9 }
  0x4b   :  { %2056 = vmatpush3.bf16.msra.mxu0 %v2176_v10  ;;  %2084 = vmatpush3.bf16.msra.mxu1 %v2178_v11 }
  0x4c   :  { %2057 = vmatprep.subr.bf16.mxu0 %v2179_v12  ;;  %2085 = vmatprep.subr.bf16.mxu1 %v2181_v14 }
  0x4d   :  { %292 = vmatmul.mubr.bf16.gmra.mrb[4].mxu0 %v2509_v13  ;;  %593 = vmatmul.mubr.bf16.gmra.mrb[4].mxu1 %v2509_v13 }
  0x4f   :  { %2058 = vmatpush3.bf16.msra.mxu0 %v2180_v15  ;;  %2086 = vmatpush3.bf16.msra.mxu1 %v2182_v16  ;;  %v939_v16 = vld [vmem:[%s2953_s1 + $0x50] sm:$0xff] }
  0x50   :  { %2059 = vmatprep.subr.bf16.mxu0 %v2183_v17  ;;  %2087 = vmatprep.subr.bf16.mxu1 %v2185_v18  ;;  %v940_v17 = vld [vmem:[%s2953_s1 + $0x70] sm:$0xff] }
  0x53   :  { %2060 = vmatpush3.bf16.msra.mxu0 %v2184_v19  ;;  %2088 = vmatpush3.bf16.msra.mxu1 %v2186_v20 }
  0x54   :  { %2061 = vmatprep.subr.bf16.mxu0 %v2187_v21  ;;  %2089 = vmatprep.subr.bf16.mxu1 %v2189_v22 }
  0x57   :  { %2062 = vmatpush3.bf16.msra.mxu0 %v2188_v23  ;;  %2090 = vmatpush3.bf16.msra.mxu1 %v2190_v24 }
  0x58   :  { %2063 = vmatprep.subr.bf16.mxu0 %v2191_v25  ;;  %2091 = vmatprep.subr.bf16.mxu1 %v2193_v26  ;;  %v1959_v25 = vcombine.high %v939_v16, %v940_v17 }
  0x5b   :  { %2064 = vmatpush3.bf16.msra.mxu0 %v2192_v27  ;;  %2092 = vmatpush3.bf16.msra.mxu1 %v2194_v28 }
  0x5c   :  { %2065 = vmatprep.subr.bf16.mxu0 %v2195_v29  ;;  %2093 = vmatprep.subr.bf16.mxu1 %v2197_v31  ;;  %v942_v31 = vld [vmem:[%s2953_s1 + $0xb0] sm:$0xff] }
  0x5f   :  { %2066 = vmatpush3.bf16.msra.mxu0 %v2196_v30  ;;  %2094 = vmatpush3.bf16.msra.mxu1 %v2198_v32  ;;  %v941_v30 = vld [vmem:[%s2953_s1 + $0x90] sm:$0xff] }
  0x60   :  { %2067 = vmatprep.subr.bf16.mxu0 %v2199_v33  ;;  %2095 = vmatprep.subr.bf16.mxu1 %v2201_v35 }
  0x63   :  { %2068 = vmatpush3.bf16.msra.mxu0 %v2200_v34  ;;  %2096 = vmatpush3.bf16.msra.mxu1 %v2202_v36 }
  0x64   :  { %1141 = vmatprep.subr.bf16.mxu0 %v1957_v39 }
 0x118   :  { %v283_v51 = vpop.f32.mrb[0].mxu0  ;;  %v584_v53 = vpop.f32.mrb[0].mxu1 }
 0x119   :  { %v284_v52 = vadd.f32 %v283_v51, %v62_v47  ;;  %v285_v54 = vpop.f32.mrb[1].mxu0  ;;  %v585_v55 = vadd.f32 %v584_v53, %v383_v48  ;;  %v586_v58 = vpop.f32.mrb[1].mxu1  ;;  %v1958_v51 = vcombine.low %v939_v16, %v940_v17  ;;  %v954_v16 = vld [vmem:[%s2953_s1 + $0x230] sm:$0xff] }
 0x11a   :  { %v286_v57 = vadd.f32 %v285_v54, %v66_v49  ;;  %v287_v59 = vpop.f32.mrb[2].mxu0  ;;  %v587_v61 = vadd.f32 %v586_v58, %v387_v50  ;;  %v588_v63 = vpop.f32.mrb[2].mxu1  ;;  %v943_v58 = vld [vmem:[%s2953_s1 + $0xd0] sm:$0xff] }
 0x11b   :  { %v302_v60 = vmax.f32 %v284_v52, 0.0  ;;  %v288_v62 = vadd.f32 %v287_v59, %v62_v47  ;;  %v289_v0 = vpop.f32.mrb[3].mxu0  ;;  %v589_v2 = vadd.f32 %v588_v63, %v383_v48  ;;  %v590_v6 = vpop.f32.mrb[3].mxu1  ;;  %v603_v9 = vmax.f32 %v585_v55, 0.0 }
 0x11c   :  { %v303_v1 = vmax.f32 %v286_v57, 0.0  ;;  %v290_v3 = vadd.f32 %v289_v0, %v66_v49  ;;  %v591_v8 = vadd.f32 %v590_v6, %v387_v50  ;;  %v604_v12 = vmax.f32 %v587_v61, 0.0  ;;  %v945_v61 = vld [vmem:[%s2953_s1 + $0x110] sm:$0xff] }
 0x11d   :  { %v304_v7 = vmax.f32 %v288_v62, 0.0  ;;  %v605_v10 = vmax.f32 %v589_v2, 0.0  ;;  %v1961_v55 = vcombine.high %v941_v30, %v942_v31  ;;  %v946_v62 = vld [vmem:[%s2953_s1 + $0x130] sm:$0xff] }
 0x11e   :  { %v305_v11 = vmax.f32 %v290_v3, 0.0  ;;  %v606_v15 = vmax.f32 %v591_v8, 0.0  ;;  %v1965_v0 = vcombine.high %v945_v61, %v946_v62  ;;  %v948_v2 = vld [vmem:[%s2953_s1 + $0x170] sm:$0xff]  ;;  %v1964_v3 = vcombine.low %v945_v61, %v946_v62  ;;  %v2213_v61 = vld [vmem:[%s2955_s3 + $0x168] sm:$0xff]  }
 0x11f   :  { %v310_v14 = vpack.c.bf16 %v304_v7, %v302_v60  ;;  %v611_v18 = vpack.c.bf16 %v605_v10, %v603_v9  ;;  %v949_v7 = vld [vmem:[%s2953_s1 + $0x190] sm:$0xff]  ;;  %v2214_v62 = vld [vmem:[%s2955_s3 + $0x128] sm:$0xff]  }
 0x120   :  { %v311_v19 = vpack.c.bf16 %v305_v11, %v303_v1  ;;  %v293_v20 = vpop.f32.mrb[4].mxu0  ;;  %v612_v21 = vpack.c.bf16 %v606_v15, %v604_v12  ;;  %v594_v23 = vpop.f32.mrb[4].mxu1  ;;  %v947_v1 = vld [vmem:[%s2953_s1 + $0x150] sm:$0xff] }
 0x121   :  { %v294_v22 = vadd.f32 %v293_v20, %v62_v47  ;;  %v295_v24 = vpop.f32.mrb[5].mxu0  ;;  %v595_v26 = vadd.f32 %v594_v23, %v383_v48  ;;  %v596_v28 = vpop.f32.mrb[5].mxu1  ;;  %v1967_v6 = vcombine.high %v947_v1, %v948_v2  ;;  %v1966_v8 = vcombine.low %v947_v1, %v948_v2  ;;  %v951_v10 = vld [vmem:[%s2953_s1 + $0x1d0] sm:$0xff]  ;;  %v2217_v1 = vld [vmem:[%s2955_s3 + $0x178] sm:$0xff]  }
 0x122   :  { %920 = vmatprep.mubr.bf16.mxu1 %v311_v19  ;;  %v296_v27 = vadd.f32 %v295_v24, %v66_v49  ;;  %v297_v29 = vpop.f32.mrb[6].mxu0  ;;  %775 = vmatprep.mubr.bf16.mxu0 %v612_v21  ;;  %v597_v33 = vadd.f32 %v596_v28, %v387_v50  ;;  %v598_v35 = vpop.f32.mrb[6].mxu1  ;;  %v952_v11 = vld [vmem:[%s2953_s1 + $0x1f0] sm:$0xff]  ;;  %v2218_v2 = vld [vmem:[%s2955_s3 + $0x138] sm:$0xff]  }
 0x123   :  { %921 = vmatmul.mubr.bf16.vlgmr.msra.gmra.mrb[8].mxu1 %v310_v14  ;;  %v306_v32 = vmax.f32 %v294_v22, 0.0  ;;  %v298_v34 = vadd.f32 %v297_v29, %v62_v47  ;;  %v299_v36 = vpop.f32.mrb[7].mxu0  ;;  %776 = vmatmul.mubr.bf16.vlgmr.msra.gmra.mrb[8].mxu0 %v611_v18  ;;  %v607_v39 = vmax.f32 %v595_v26, 0.0  ;;  %v599_v42 = vadd.f32 %v598_v35, %v383_v48  ;;  %v600_v45 = vpop.f32.mrb[7].mxu1  ;;  %v944_v48 = vld [vmem:[%s2953_s1 + $0xf0] sm:$0xff] }
 0x124   :  { %v307_v41 = vmax.f32 %v296_v27, 0.0  ;;  %v300_v43 = vadd.f32 %v299_v36, %v66_v49  ;;  %1142 = vmatpush1.bf16.msra.mxu0 %v1956_v40  ;;  %v608_v52 = vmax.f32 %v597_v33, 0.0  ;;  %v601_v54 = vadd.f32 %v600_v45, %v387_v50  ;;  %v953_v15 = vld [vmem:[%s2953_s1 + $0x210] sm:$0xff] }
 0x125   :  { %v308_v53 = vmax.f32 %v298_v34, 0.0  ;;  %1143 = vmatprep.subr.bf16.mxu0 %v1959_v25  ;;  %v609_v57 = vmax.f32 %v599_v42, 0.0  ;;  %v1960_v40 = vcombine.low %v941_v30, %v942_v31  ;;  %v1963_v50 = vcombine.high %v943_v58, %v944_v48  ;;  %v955_v19 = vld [vmem:[%s2953_s1 + $0x250] sm:$0xff] }
 0x126   :  { %v309_v47 = vmax.f32 %v300_v43, 0.0  ;;  %v610_v59 = vmax.f32 %v601_v54, 0.0  ;;  %v1962_v63 = vcombine.low %v943_v58, %v944_v48  ;;  %v1971_v14 = vcombine.high %v951_v10, %v952_v11  ;;  %v956_v20 = vld [vmem:[%s2953_s1 + $0x270] sm:$0xff]  ;;  %v2204_v58 = vld [vmem:[%s2955_s3 + $0x100] sm:$0xff]   ;;  %v2205_v48 = vld [vmem:[%s2955_s3 + $0x148] sm:$0xff]  }
 0x127   :  { %v312_v49 = vpack.c.bf16 %v308_v53, %v306_v32  ;;  %v613_v37 = vpack.c.bf16 %v609_v57, %v607_v39  ;;  %v1970_v17 = vcombine.low %v951_v10, %v952_v11  ;;  %v1973_v18 = vcombine.high %v953_v15, %v954_v16  ;;  %v957_v23 = vld [vmem:[%s2953_s1 + $0x290] sm:$0xff] }
 0x128   :  { %v313_v38 = vpack.c.bf16 %v309_v47, %v307_v41  ;;  %1144 = vmatpush1.bf16.msra.mxu0 %v1958_v51  ;;  %v614_v60 = vpack.c.bf16 %v610_v59, %v608_v52  ;;  %v1972_v21 = vcombine.low %v953_v15, %v954_v16  ;;  %v1975_v22 = vcombine.high %v955_v19, %v956_v20  ;;  %v958_v24 = vld [vmem:[%s2953_s1 + $0x2b0] sm:$0xff]  ;;  %v2203_v47 = vld [vmem:[%s2955_s3 + $0x140] sm:$0xff]  }
 0x129   :  { %1145 = vmatprep.subr.bf16.mxu0 %v1961_v55  ;;  %v1974_v25 = vcombine.low %v955_v19, %v956_v20  ;;  %v1977_v26 = vcombine.high %v957_v23, %v958_v24  ;;  %v959_v27 = vld [vmem:[%s2953_s1 + $0x2d0] sm:$0xff]  ;;  %v1976_v29 = vcombine.low %v957_v23, %v958_v24  ;;  %2109 = vmatprep.subr.bf16.mxu1 %v2203_v47 }
 0x12a   :  { %928 = vmatprep.mubr.bf16.mxu1 %v313_v38  ;;  %783 = vmatprep.mubr.bf16.mxu0 %v614_v60  ;;  %v960_v28 = vld [vmem:[%s2953_s1 + $0x2f0] sm:$0xff]  ;;  %v2209_v38 = vld [vmem:[%s2955_s3 + $0x158] sm:$0xff]   ;;  %v2211_v60 = vld [vmem:[%s2955_s3 + $0x160] sm:$0xff]  }
 0x12b   :  { %929 = vmatmul.mubr.bf16.gmra.mrb[12].mxu1 %v312_v49  ;;  %784 = vmatmul.mubr.bf16.gmra.mrb[12].mxu0 %v613_v37  ;;  %v1979_v30 = vcombine.high %v959_v27, %v960_v28  ;;  %v961_v31 = vld [vmem:[%s2953_s1 + $0x310] sm:$0xff]  ;;  %v1978_v33 = vcombine.low %v959_v27, %v960_v28  ;;  %v2206_v49 = vld [vmem:[%s2955_s3 + $0x108] sm:$0xff]  }
 0x12c   :  { %1146 = vmatpush1.bf16.msra.mxu0 %v1960_v40  ;;  %1173 = vmatprep.mubr.bf16.mxu0 %v2359_v56  ;;  %v950_v56 = vld [vmem:[%s2953_s1 + $0x1b0] sm:$0xff]  ;;  %v2210_v40 = vld [vmem:[%s2955_s3 + $0x118] sm:$0xff]  }
 0x12d   :  { %1147 = vmatprep.subr.bf16.mxu0 %v1963_v50  ;;  %v1969_v9 = vcombine.high %v949_v7, %v950_v56  ;;  %v1968_v12 = vcombine.low %v949_v7, %v950_v56  ;;  %v962_v32 = vld [vmem:[%s2953_s1 + $0x330] sm:$0xff]  ;;  %2110 = vmatpush3.bf16.msra.mxu1 %v2204_v58  ;;  %v2212_v50 = vld [vmem:[%s2955_s3 + $0x120] sm:$0xff]  }
 0x12e   :  { %v1981_v34 = vcombine.high %v961_v31, %v962_v32  ;;  %v963_v35 = vld [vmem:[%s2953_s1 + $0x350] sm:$0xff]  ;;  %v1980_v39 = vcombine.low %v961_v31, %v962_v32  ;;  %2111 = vmatprep.subr.bf16.mxu1 %v2205_v48 }
 0x12f   :  { %v964_v36 = vld [vmem:[%s2953_s1 + $0x370] sm:$0xff] }
 0x130   :  { %1148 = vmatpush1.bf16.msra.mxu0 %v1962_v63  ;;  %v1983_v41 = vcombine.high %v963_v35, %v964_v36  ;;  %v965_v42 = vld [vmem:[%s2953_s1 + $0x390] sm:$0xff]  ;;  %v1982_v45 = vcombine.low %v963_v35, %v964_v36 }
 0x131   :  { %1149 = vmatprep.subr.bf16.mxu0 %v1965_v0  ;;  %v966_v43 = vld [vmem:[%s2953_s1 + $0x3b0] sm:$0xff]  ;;  %2112 = vmatpush3.bf16.msra.mxu1 %v2206_v49 }
 0x132   :  { %v1985_v51 = vcombine.high %v965_v42, %v966_v43  ;;  %v967_v52 = vld [vmem:[%s2953_s1 + $0x3d0] sm:$0xff]  ;;  %v1984_v54 = vcombine.low %v965_v42, %v966_v43 }
 0x133   :  { %v968_v53 = vld [vmem:[%s2953_s1 + $0x3f0] sm:$0xff] }
 0x134   :  { %1150 = vmatpush1.bf16.msra.mxu0 %v1964_v3  ;;  %v1987_v55 = vcombine.high %v967_v52, %v968_v53  ;;  %v1986_v57 = vcombine.low %v967_v52, %v968_v53  ;;  %v2207_v59 = vld [vmem:[%s2955_s3 + $0x150] sm:$0xff]   ;;  %v2758_v3 = vld [vmem:[%s2953_s1 + $0x18] sm:$0xff] }
 0x135   :  { %1151 = vmatprep.subr.bf16.mxu0 %v1967_v6  ;;  %v2208_v37 = vld [vmem:[%s2955_s3 + $0x110] sm:$0xff]   ;;  %2113 = vmatprep.subr.bf16.mxu1 %v2207_v59  ;;  %v2763_v6 = vld [vmem:[%s2953_s1 + $0x38] sm:$0xff] }
 0x136   :  { %2114 = vmatpush3.bf16.msra.mxu1 %v2208_v37  ;;  %v2215_v63 = vld [vmem:[%s2955_s3 + $0x170] sm:$0xff]   ;;  %v2005_v7 = vcombine.high %v2758_v3, %v2763_v6  ;;  %v2004_v56 = vcombine.low %v2758_v3, %v2763_v6  ;;  %v1389_v59 = vld [vmem:[%s2953_s1 + $0x58] sm:$0xff] }
 0x137   :  { %2115 = vmatprep.subr.bf16.mxu1 %v2209_v38  ;;  %v2216_v0 = vld [vmem:[%s2955_s3 + $0x130] sm:$0xff]   ;;  %v1390_v37 = vld [vmem:[%s2953_s1 + $0x78] sm:$0xff] }
 0x138   :  { %1152 = vmatpush1.bf16.msra.mxu0 %v1966_v8  ;;  %v1395_v6 = vld [vmem:[%s2953_s1 + $0x118] sm:$0xff] }
 0x139   :  { %1153 = vmatprep.subr.bf16.mxu0 %v1969_v9 }
 0x13a   :  { %2116 = vmatpush3.bf16.msra.mxu1 %v2210_v40 }
 0x13b   :  { %2117 = vmatprep.subr.bf16.mxu1 %v2211_v60 }
 0x13c   :  { %1154 = vmatpush1.bf16.msra.mxu0 %v1968_v12 }
 0x13d   :  { %1155 = vmatprep.subr.bf16.mxu0 %v1971_v14 }
 0x13e   :  { %2118 = vmatpush3.bf16.msra.mxu1 %v2212_v50 }
 0x13f   :  { %2119 = vmatprep.subr.bf16.mxu1 %v2213_v61 }
 0x140   :  { %1156 = vmatpush1.bf16.msra.mxu0 %v1970_v17 }
 0x141   :  { %1157 = vmatprep.subr.bf16.mxu0 %v1973_v18 }
 0x142   :  { %2120 = vmatpush3.bf16.msra.mxu1 %v2214_v62  ;;  %v2007_v62 = vcombine.high %v1389_v59, %v1390_v37 }
 0x143   :  { %2121 = vmatprep.subr.bf16.mxu1 %v2215_v63 }
 0x144   :  { %1158 = vmatpush1.bf16.msra.mxu0 %v1972_v21 }
 0x145   :  { %1159 = vmatprep.subr.bf16.mxu0 %v1975_v22 }
 0x146   :  { %2122 = vmatpush3.bf16.msra.mxu1 %v2216_v0 }
 0x147   :  { %2123 = vmatprep.subr.bf16.mxu1 %v2217_v1  ;;  %v1391_v1 = vld [vmem:[%s2953_s1 + $0x98] sm:$0xff] }
 0x148   :  { %1160 = vmatpush1.bf16.msra.mxu0 %v1974_v25 }
 0x149   :  { %1161 = vmatprep.subr.bf16.mxu0 %v1977_v26 }
 0x14a   :  { %2124 = vmatpush3.bf16.msra.mxu1 %v2218_v2  ;;  %v1392_v2 = vld [vmem:[%s2953_s1 + $0xb8] sm:$0xff] }
 0x14b   :  { %1591 = vmatprep.subr.bf16.mxu1 %v2005_v7 }
 0x14c   :  { %1162 = vmatpush1.bf16.msra.mxu0 %v1976_v29 }
 0x14d   :  { %1163 = vmatprep.subr.bf16.mxu0 %v1979_v30 }
 0x150   :  { %1164 = vmatpush1.bf16.msra.mxu0 %v1978_v33 }
 0x151   :  { %1165 = vmatprep.subr.bf16.mxu0 %v1981_v34 }
 0x154   :  { %1166 = vmatpush1.bf16.msra.mxu0 %v1980_v39  ;;  %v969_v39 = vld [vmem:[%s2956_s2 + $0x4] sm:$0x3] }
 0x155   :  { %1167 = vmatprep.subr.bf16.mxu0 %v1983_v41  ;;  %v974_v41 = vrot.slane %v969_v39, %v2599_v44  ;;  %v978_v42 = vrot.slane %v969_v39, %v2604_v46  ;;  %v1401_v39 = vld [vmem:[%s2953_s1 + $0x1d8] sm:$0xff] }
 0x158   :  { %1168 = vmatpush1.bf16.msra.mxu0 %v1982_v45 }
 0x159   :  { %1169 = vmatprep.subr.bf16.mxu0 %v1985_v51 }
 0x15c   :  { %1170 = vmatpush1.bf16.msra.mxu0 %v1984_v54 }
 0x15d   :  { %1171 = vmatprep.subr.bf16.mxu0 %v1987_v55 }
 0x160   :  { %1172 = vmatpush1.bf16.msra.mxu0 %v1986_v57 }
 0x163   :  { %1174 = vmatmul.mubr.bf16.vlgmr.msra.gmra.mrb[16].mxu0 %v2474_v4 }
 0x164   :  { %1183 = vmatprep.mubr.bf16.mxu0 %v2479_v5 }
 0x16b   :  { %1184 = vmatmul.mubr.bf16.gmra.mrb[20].mxu0 %v2509_v13 }
 0x1f6   :  { %v2097_v8 = vpop.f32.mrb[8].mxu1  ;;  %v2069_v9 = vpop.f32.mrb[8].mxu0 }
 0x1f7   :  { %v2098_v10 = vpop.f32.mrb[9].mxu1  ;;  %v2070_v11 = vpop.f32.mrb[9].mxu0 }
 0x1f8   :  { %v2099_v12 = vadd.f32 %v2098_v10, %v2097_v8  ;;  %v2100_v14 = vpop.f32.mrb[10].mxu1  ;;  %v2071_v15 = vadd.f32 %v2070_v11, %v2069_v9  ;;  %v2072_v16 = vpop.f32.mrb[10].mxu0 }
 0x1f9   :  { %v2101_v17 = vpop.f32.mrb[11].mxu1  ;;  %v2073_v18 = vpop.f32.mrb[11].mxu0 }
 0x1fa   :  { %v2102_v19 = vadd.f32 %v2101_v17, %v2100_v14  ;;  %v2769_v20 = vadd.f32 %v2099_v12, %v2071_v15  ;;  %v2074_v21 = vadd.f32 %v2073_v18, %v2072_v16  ;;  %v2006_v12 = vcombine.low %v1389_v59, %v1390_v37  ;;  %v1393_v17 = vld [vmem:[%s2953_s1 + $0xd8] sm:$0xff] }
 0x1fb   :  { %v2009_v15 = vcombine.high %v1391_v1, %v1392_v2  ;;  %v1394_v18 = vld [vmem:[%s2953_s1 + $0xf8] sm:$0xff] }
 0x1fc   :  { %v2771_v22 = vadd.f32 %v2102_v19, %v2074_v21  ;;  %v2011_v3 = vcombine.high %v1393_v17, %v1394_v18  ;;  %v1409_v37 = vld [vmem:[%s2953_s1 + $0x2d8] sm:$0xff] }
 0x1fe   :  { %v2103_v23 = vpop.f32.mrb[12].mxu1  ;;  %v2075_v24 = vpop.f32.mrb[12].mxu0 }
 0x1ff   :  { %v2104_v25 = vpop.f32.mrb[13].mxu1  ;;  %v2076_v26 = vpop.f32.mrb[13].mxu0 }
 0x200   :  { %v2105_v27 = vadd.f32 %v2104_v25, %v2103_v23  ;;  %v2106_v28 = vpop.f32.mrb[14].mxu1  ;;  %v2077_v29 = vadd.f32 %v2076_v26, %v2075_v24  ;;  %v2078_v30 = vpop.f32.mrb[14].mxu0  ;;  %v2008_v23 = vcombine.low %v1391_v1, %v1392_v2  ;;  %v2010_v24 = vcombine.low %v1393_v17, %v1394_v18  ;;  %v2235_v25 = vld [vmem:[%s2954_s0 + $0x4] ss:$8 sps:$4 sm:$0xff]   ;;  %v1414_v1 = vld [vmem:[%s2953_s1 + $0x378] sm:$0xff] }
 0x201   :  { %v2107_v31 = vpop.f32.mrb[15].mxu1  ;;  %v2079_v32 = vpop.f32.mrb[15].mxu0  ;;  %v2219_v18 = vld [vmem:[%s2955_s3 + $0x1c0] sm:$0xff]  }
 0x202   :  { %v2108_v33 = vadd.f32 %v2107_v31, %v2106_v28  ;;  %v2773_v34 = vadd.f32 %v2105_v27, %v2077_v29  ;;  %v2080_v35 = vadd.f32 %v2079_v32, %v2078_v30  ;;  %v1397_v27 = vld [vmem:[%s2953_s1 + $0x158] sm:$0xff]  ;;  %2137 = vmatprep.subr.bf16.mxu0 %v2219_v18 }
 0x203   :  { %v1398_v28 = vld [vmem:[%s2953_s1 + $0x178] sm:$0xff] }
 0x204   :  { %v2775_v36 = vadd.f32 %v2108_v33, %v2080_v35  ;;  %v2015_v30 = vcombine.high %v1397_v27, %v1398_v28  ;;  %v1399_v31 = vld [vmem:[%s2953_s1 + $0x198] sm:$0xff]  ;;  %v2014_v33 = vcombine.low %v1397_v27, %v1398_v28  ;;  %v2232_v27 = vld [vmem:[%s2955_s3 + $0x1b0] sm:$0xff]  }
 0x205   :  { %v1400_v32 = vld [vmem:[%s2953_s1 + $0x1b8] sm:$0xff] }
 0x206   :  { %v2017_v35 = vcombine.high %v1399_v31, %v1400_v32  ;;  %v2233_v28 = vld [vmem:[%s2955_s3 + $0x1f8] sm:$0xff]  }
 0x236   :  { %v1175_v43 = vpop.f32.mrb[16].mxu0 }
 0x237   :  { %v1176_v45 = vadd.f32 %v1175_v43, %v974_v41  ;;  %v1177_v51 = vpop.f32.mrb[17].mxu0 }
 0x238   :  { %v1178_v52 = vadd.f32 %v1177_v51, %v978_v42  ;;  %v1179_v53 = vpop.f32.mrb[18].mxu0  ;;  %v1404_v51 = vld [vmem:[%s2953_s1 + $0x238] sm:$0xff] }
 0x239   :  { %v1180_v54 = vadd.f32 %v1179_v53, %v974_v41  ;;  %v1181_v55 = vpop.f32.mrb[19].mxu0  ;;  %v1194_v47 = vmax.f32 %v1176_v45, 0.0  ;;  %v1403_v45 = vld [vmem:[%s2953_s1 + $0x218] sm:$0xff] }
 0x23a   :  { %v1182_v57 = vadd.f32 %v1181_v55, %v978_v42  ;;  %v1195_v48 = vmax.f32 %v1178_v52, 0.0  ;;  %v2021_v53 = vcombine.high %v1403_v45, %v1404_v51  ;;  %v1406_v55 = vld [vmem:[%s2953_s1 + $0x278] sm:$0xff] }
 0x23b   :  { %v1196_v58 = vmax.f32 %v1180_v54, 0.0  ;;  %v1405_v54 = vld [vmem:[%s2953_s1 + $0x258] sm:$0xff] }
 0x23c   :  { %v1197_v49 = vmax.f32 %v1182_v57, 0.0  ;;  %v2020_v57 = vcombine.low %v1403_v45, %v1404_v51 }
 0x23d   :  { %v1202_v38 = vpack.c.bf16 %v1196_v58, %v1194_v47  ;;  %v2023_v47 = vcombine.high %v1405_v54, %v1406_v55  ;;  %v1407_v58 = vld [vmem:[%s2953_s1 + $0x298] sm:$0xff] }
 0x23e   :  { %v1203_v40 = vpack.c.bf16 %v1197_v49, %v1195_v48  ;;  %v1185_v60 = vpop.f32.mrb[20].mxu0  ;;  %v1408_v48 = vld [vmem:[%s2953_s1 + $0x2b8] sm:$0xff]  ;;  %v2022_v49 = vcombine.low %v1405_v54, %v1406_v55 }
 0x23f   :  { %v1186_v50 = vadd.f32 %v1185_v60, %v974_v41  ;;  %v1187_v61 = vpop.f32.mrb[21].mxu0  ;;  %v2025_v59 = vcombine.high %v1407_v58, %v1408_v48 }
 0x240   :  { %v1188_v63 = vadd.f32 %v1187_v61, %v978_v42  ;;  %v1189_v0 = vpop.f32.mrb[22].mxu0  ;;  %1366 = vmatprep.mubr.bf16.mxu1 %v1203_v40  ;;  %v2024_v40 = vcombine.low %v1407_v58, %v1408_v48  ;;  %v1412_v61 = vld [vmem:[%s2953_s1 + $0x338] sm:$0xff] }
 0x241   :  { %v1198_v7 = vmax.f32 %v1186_v50, 0.0  ;;  %v1190_v8 = vadd.f32 %v1189_v0, %v974_v41  ;;  %v1191_v9 = vpop.f32.mrb[23].mxu0  ;;  %1367 = vmatmul.mubr.bf16.vlgmr.msra.gmra.mrb[16].mxu1 %v1202_v38  ;;  %v1402_v41 = vld [vmem:[%s2953_s1 + $0x1f8] sm:$0xff] }
 0x242   :  { %v1199_v10 = vmax.f32 %v1188_v63, 0.0  ;;  %v1192_v11 = vadd.f32 %v1191_v9, %v978_v42  ;;  %1592 = vmatpush1.bf16.msra.mxu1 %v2004_v56  ;;  %v1396_v56 = vld [vmem:[%s2953_s1 + $0x138] sm:$0xff]  ;;  %v2016_v42 = vcombine.low %v1399_v31, %v1400_v32  ;;  %v2019_v43 = vcombine.high %v1401_v39, %v1402_v41 }
 0x243   :  { %v1200_v14 = vmax.f32 %v1190_v8, 0.0  ;;  %1593 = vmatprep.subr.bf16.mxu1 %v2007_v62  ;;  %v2013_v26 = vcombine.high %v1395_v6, %v1396_v56  ;;  %v2012_v29 = vcombine.low %v1395_v6, %v1396_v56  ;;  %v2018_v52 = vcombine.low %v1401_v39, %v1402_v41  ;;  %v1410_v38 = vld [vmem:[%s2953_s1 + $0x2f8] sm:$0xff]  ;;  %v2227_v6 = vld [vmem:[%s2955_s3 + $0x1e0] sm:$0xff]  }
 0x244   :  { %v1201_v16 = vmax.f32 %v1192_v11, 0.0  ;;  %v2027_v60 = vcombine.high %v1409_v37, %v1410_v38  ;;  %v1411_v50 = vld [vmem:[%s2953_s1 + $0x318] sm:$0xff]  ;;  %v2026_v62 = vcombine.low %v1409_v37, %v1410_v38  ;;  %v2228_v56 = vld [vmem:[%s2955_s3 + $0x1a0] sm:$0xff]  }
 0x245   :  { %v1204_v19 = vpack.c.bf16 %v1200_v14, %v1198_v7  ;;  %v2029_v63 = vcombine.high %v1411_v50, %v1412_v61  ;;  %v1413_v0 = vld [vmem:[%s2953_s1 + $0x358] sm:$0xff]  ;;  %v2028_v2 = vcombine.low %v1411_v50, %v1412_v61 }
 0x246   :  { %v1205_v21 = vpack.c.bf16 %v1201_v16, %v1199_v10  ;;  %1594 = vmatpush1.bf16.msra.mxu1 %v2006_v12  ;;  %v2031_v7 = vcombine.high %v1413_v0, %v1414_v1  ;;  %v1415_v8 = vld [vmem:[%s2953_s1 + $0x398] sm:$0xff]  ;;  %v2030_v10 = vcombine.low %v1413_v0, %v1414_v1 }
 0x247   :  { %1595 = vmatprep.subr.bf16.mxu1 %v2009_v15  ;;  %v1416_v9 = vld [vmem:[%s2953_s1 + $0x3b8] sm:$0xff] }
 0x248   :  { %1374 = vmatprep.mubr.bf16.mxu1 %v1205_v21  ;;  %v2033_v11 = vcombine.high %v1415_v8, %v1416_v9  ;;  %v1417_v12 = vld [vmem:[%s2953_s1 + $0x3d8] sm:$0xff]  ;;  %v2032_v15 = vcombine.low %v1415_v8, %v1416_v9  ;;  %v2221_v21 = vld [vmem:[%s2955_s3 + $0x1c8] sm:$0xff]  }
 0x249   :  { %1375 = vmatmul.mubr.bf16.gmra.mrb[20].mxu1 %v1204_v19  ;;  %v1418_v14 = vld [vmem:[%s2953_s1 + $0x3f8] sm:$0xff]  ;;  %v2220_v19 = vld [vmem:[%s2955_s3 + $0x180] sm:$0xff]  }
 0x24a   :  { %1596 = vmatpush1.bf16.msra.mxu1 %v2008_v23  ;;  %1623 = vmatprep.mubr.bf16.mxu1 %v2235_v25  ;;  %v2035_v16 = vcombine.high %v1417_v12, %v1418_v14  ;;  %v2034_v17 = vcombine.low %v1417_v12, %v1418_v14  ;;  %v2225_v23 = vld [vmem:[%s2955_s3 + $0x1d8] sm:$0xff]   ;;  %v2230_v25 = vld [vmem:[%s2955_s3 + $0x1a8] sm:$0xff]  }
 0x24b   :  { %1597 = vmatprep.subr.bf16.mxu1 %v2011_v3  ;;  %2138 = vmatpush3.bf16.msra.mxu0 %v2220_v19  ;;  %v2226_v3 = vld [vmem:[%s2955_s3 + $0x198] sm:$0xff]  }
 0x24c   :  { %2139 = vmatprep.subr.bf16.mxu0 %v2221_v21 }
 0x24e   :  { %1598 = vmatpush1.bf16.msra.mxu1 %v2010_v24  ;;  %v2229_v24 = vld [vmem:[%s2955_s3 + $0x1e8] sm:$0xff]  }
 0x24f   :  { %1599 = vmatprep.subr.bf16.mxu1 %v2013_v26  ;;  %v2231_v26 = vld [vmem:[%s2955_s3 + $0x1f0] sm:$0xff]  }
 0x252   :  { %1600 = vmatpush1.bf16.msra.mxu1 %v2012_v29  ;;  %v2234_v29 = vld [vmem:[%s2955_s3 + $0x1b8] sm:$0xff]  }
 0x253   :  { %1601 = vmatprep.subr.bf16.mxu1 %v2015_v30 }
 0x256   :  { %1602 = vmatpush1.bf16.msra.mxu1 %v2014_v33 }
 0x257   :  { %1603 = vmatprep.subr.bf16.mxu1 %v2017_v35 }
 0x25a   :  { %1604 = vmatpush1.bf16.msra.mxu1 %v2016_v42 }
 0x25b   :  { %1605 = vmatprep.subr.bf16.mxu1 %v2019_v43 }
 0x25e   :  { %1606 = vmatpush1.bf16.msra.mxu1 %v2018_v52 }
 0x25f   :  { %1607 = vmatprep.subr.bf16.mxu1 %v2021_v53 }
 0x262   :  { %1608 = vmatpush1.bf16.msra.mxu1 %v2020_v57 }
 0x263   :  { %1609 = vmatprep.subr.bf16.mxu1 %v2023_v47  ;;  %v1419_v47 = vld [vmem:[%s2956_s2 + $0x6] sm:$0x3] }
 0x264   :  { %v1424_v58 = vrot.slane %v1419_v47, %v2599_v44 }
 0x266   :  { %1610 = vmatpush1.bf16.msra.mxu1 %v2022_v49 }
 0x267   :  { %1611 = vmatprep.subr.bf16.mxu1 %v2025_v59 }
 0x26a   :  { %1612 = vmatpush1.bf16.msra.mxu1 %v2024_v40 }
 0x26b   :  { %1613 = vmatprep.subr.bf16.mxu1 %v2027_v60 }
 0x26e   :  { %1614 = vmatpush1.bf16.msra.mxu1 %v2026_v62 }
 0x26f   :  { %1615 = vmatprep.subr.bf16.mxu1 %v2029_v63 }
 0x272   :  { %1616 = vmatpush1.bf16.msra.mxu1 %v2028_v2 }
 0x273   :  { %1617 = vmatprep.subr.bf16.mxu1 %v2031_v7 }
 0x276   :  { %1618 = vmatpush1.bf16.msra.mxu1 %v2030_v10 }
 0x277   :  { %1619 = vmatprep.subr.bf16.mxu1 %v2033_v11 }
 0x27a   :  { %1620 = vmatpush1.bf16.msra.mxu1 %v2032_v15 }
 0x27b   :  { %1621 = vmatprep.subr.bf16.mxu1 %v2035_v16 }
 0x27e   :  { %1622 = vmatpush1.bf16.msra.mxu1 %v2034_v17 }
 0x281   :  { %1624 = vmatmul.mubr.bf16.vlgmr.msra.gmra.mrb[24].mxu1 %v2474_v4  ;;  %v2222_v4 = vld [vmem:[%s2955_s3 + $0x188] sm:$0xff]  }
 0x282   :  { %1633 = vmatprep.mubr.bf16.mxu1 %v2479_v5  ;;  %v2223_v5 = vld [vmem:[%s2955_s3 + $0x1d0] sm:$0xff]   ;;  %2140 = vmatpush3.bf16.msra.mxu0 %v2222_v4  ;;  %v2052_v4 = vld [vmem:[%s2957_s4] ss:$0 sm:$0xff] }
 0x283   :  { %2141 = vmatprep.subr.bf16.mxu0 %v2223_v5 }
 0x289   :  { %1634 = vmatmul.mubr.bf16.gmra.mrb[28].mxu1 %v2509_v13  ;;  %v2224_v13 = vld [vmem:[%s2955_s3 + $0x190] sm:$0xff]  }
 0x28a   :  { %2142 = vmatpush3.bf16.msra.mxu0 %v2224_v13 }
 0x28b   :  { %2143 = vmatprep.subr.bf16.mxu0 %v2225_v23 }
 0x28e   :  { %2144 = vmatpush3.bf16.msra.mxu0 %v2226_v3 }
 0x28f   :  { %2145 = vmatprep.subr.bf16.mxu0 %v2227_v6 }
 0x292   :  { %2146 = vmatpush3.bf16.msra.mxu0 %v2228_v56 }
 0x293   :  { %2147 = vmatprep.subr.bf16.mxu0 %v2229_v24 }
 0x296   :  { %2148 = vmatpush3.bf16.msra.mxu0 %v2230_v25 }
 0x297   :  { %2149 = vmatprep.subr.bf16.mxu0 %v2231_v26 }
 0x29a   :  { %2150 = vmatpush3.bf16.msra.mxu0 %v2232_v27 }
 0x29b   :  { %2151 = vmatprep.subr.bf16.mxu0 %v2233_v28 }
 0x29e   :  { %2152 = vmatpush3.bf16.msra.mxu0 %v2234_v29 }
 0x314   :  { %v2125_v30 = vpop.f32.mrb[16].mxu1 }
 0x315   :  { %v2126_v31 = vpop.f32.mrb[17].mxu1 }
 0x316   :  { %v2127_v32 = vadd.f32 %v2126_v31, %v2125_v30  ;;  %v2128_v33 = vpop.f32.mrb[18].mxu1 }
 0x317   :  { %v2129_v35 = vpop.f32.mrb[19].mxu1 }
 0x318   :  { %v1383_v39 = vadd.f32 %v2127_v32, %v2769_v20  ;;  %v2130_v41 = vadd.f32 %v2129_v35, %v2128_v33  ;;  %v1428_v20 = vrot.slane %v1419_v47, %v2604_v46 }
 0x31a   :  { %v1384_v42 = vadd.f32 %v2130_v41, %v2771_v22 }
 0x31c   :  { %v2131_v43 = vpop.f32.mrb[20].mxu1 }
 0x31d   :  { %v2132_v45 = vpop.f32.mrb[21].mxu1 }
 0x31e   :  { %v2133_v51 = vadd.f32 %v2132_v45, %v2131_v43  ;;  %v2134_v52 = vpop.f32.mrb[22].mxu1 }
 0x31f   :  { %v2135_v53 = vpop.f32.mrb[23].mxu1 }
 0x320   :  { %v1385_v54 = vadd.f32 %v2133_v51, %v2773_v34  ;;  %v2136_v55 = vadd.f32 %v2135_v53, %v2134_v52 }
 0x322   :  { %v1386_v57 = vadd.f32 %v2136_v55, %v2775_v36 }
 0x354   :  { %v1625_v48 = vpop.f32.mrb[24].mxu1 }
 0x355   :  { %v1626_v22 = vadd.f32 %v1625_v48, %v1424_v58  ;;  %v1627_v49 = vpop.f32.mrb[25].mxu1 }
 0x356   :  { %v1628_v59 = vadd.f32 %v1627_v49, %v1428_v20  ;;  %v1629_v37 = vpop.f32.mrb[26].mxu1 }
 0x357   :  { %v1630_v38 = vadd.f32 %v1629_v37, %v1424_v58  ;;  %v1631_v40 = vpop.f32.mrb[27].mxu1  ;;  %v1644_v34 = vmax.f32 %v1626_v22, 0.0 }
 0x358   :  { %v1632_v60 = vadd.f32 %v1631_v40, %v1428_v20  ;;  %v1645_v61 = vmax.f32 %v1628_v59, 0.0 }
 0x359   :  { %v1646_v50 = vmax.f32 %v1630_v38, 0.0 }
 0x35a   :  { %v1647_v36 = vmax.f32 %v1632_v60, 0.0 }
 0x35b   :  { %v1652_v62 = vpack.c.bf16 %v1646_v50, %v1644_v34 }
 0x35c   :  { %v1653_v63 = vpack.c.bf16 %v1647_v36, %v1645_v61  ;;  %v1635_v0 = vpop.f32.mrb[28].mxu1 }
 0x35d   :  { %v1636_v1 = vadd.f32 %v1635_v0, %v1424_v58  ;;  %v1637_v2 = vpop.f32.mrb[29].mxu1 }
 0x35e   :  { %v1638_v44 = vadd.f32 %v1637_v2, %v1428_v20  ;;  %v1639_v7 = vpop.f32.mrb[30].mxu1  ;;  %1816 = vmatprep.mubr.bf16.mxu0 %v1653_v63 }
 0x35f   :  { %v1640_v46 = vadd.f32 %v1639_v7, %v1424_v58  ;;  %v1641_v8 = vpop.f32.mrb[31].mxu1  ;;  %1817 = vmatmul.mubr.bf16.vlgmr.msra.gmra.mrb[24].mxu0 %v1652_v62  ;;  %v1648_v10 = vmax.f32 %v1636_v1, 0.0 }
 0x360   :  { %v1642_v9 = vadd.f32 %v1641_v8, %v1428_v20  ;;  %v1649_v12 = vmax.f32 %v1638_v44, 0.0 }
 0x361   :  { %v1650_v11 = vmax.f32 %v1640_v46, 0.0 }
 0x362   :  { %v1651_v14 = vmax.f32 %v1642_v9, 0.0 }
 0x363   :  { %v1654_v15 = vpack.c.bf16 %v1650_v11, %v1648_v10 }
 0x364   :  { %v1655_v16 = vpack.c.bf16 %v1651_v14, %v1649_v12 }
 0x366   :  { %1824 = vmatprep.mubr.bf16.mxu0 %v1655_v16 }
 0x367   :  { %1825 = vmatmul.mubr.bf16.gmra.mrb[28].mxu0 %v1654_v15 }
 0x432   :  { %v2153_v17 = vpop.f32.mrb[24].mxu0 }
 0x433   :  { %v2154_v18 = vpop.f32.mrb[25].mxu0 }
 0x434   :  { %v2155_v19 = vadd.f32 %v2154_v18, %v2153_v17  ;;  %v2156_v21 = vpop.f32.mrb[26].mxu0 }
 0x435   :  { %v2157_v5 = vpop.f32.mrb[27].mxu0 }
 0x436   :  { %v1833_v13 = vadd.f32 %v2155_v19, %v1383_v39  ;;  %v2158_v23 = vadd.f32 %v2157_v5, %v2156_v21 }
 0x438   :  { %v1844_v3 = vadd.f32 %v2052_v4, %v1833_v13  ;;  %v1834_v6 = vadd.f32 %v2158_v23, %v1384_v42 }
 0x43a   :  { %1848 = vst [vmem:[%s2958_s5] sm:$0xff] %v1844_v3  ;;  %v1845_v56 = vadd.f32 %v2052_v4, %v1834_v6  ;;  %v2159_v24 = vpop.f32.mrb[28].mxu0 }
 0x43b   :  { %v2160_v25 = vpop.f32.mrb[29].mxu0 }
 0x43c   :  { %1849 = vst [vmem:[%s2958_s5 + $0x8] sm:$0xff] %v1845_v56  ;;  %v2161_v26 = vadd.f32 %v2160_v25, %v2159_v24  ;;  %v2162_v27 = vpop.f32.mrb[30].mxu0 }
 0x43d   :  { %v2163_v28 = vpop.f32.mrb[31].mxu0 }
 0x43e   :  { %v1835_v29 = vadd.f32 %v2161_v26, %v1385_v54  ;;  %v2164_v30 = vadd.f32 %v2163_v28, %v2162_v27 }
 0x440   :  { %v1846_v31 = vadd.f32 %v2052_v4, %v1835_v29  ;;  %v1836_v32 = vadd.f32 %v2164_v30, %v1386_v57 }
 0x442   :  { %1850 = vst [vmem:[%s2958_s5 + $0x10] sm:$0xff] %v1846_v31  ;;  %v1847_v33 = vadd.f32 %v2052_v4, %v1836_v32 }
 0x444   :  { %1851 = vst [vmem:[%s2958_s5 + $0x18] sm:$0xff] %v1847_v33 }

</bundles_post_ra>
